<compile_context>
chip_gen: v5e
topology: v5e:2x2
jax: 0.10.0
libtpu: 0.0.40
codegen_flags: <defaults>
</compile_context>

<pallas_src>
import jax
import jax.numpy as jnp
from jax.experimental import pallas as pl
from jax.experimental.pallas import tpu as pltpu

DATA_SIZE = 27     # n_x
HIDDEN_SIZE = 100  # n_a
OUTPUT_SIZE = 27   # n_y
LANE = 128         # padded lane width for hidden / logits


def rnn_block_kernel(x_ref, h0_ref, wx_ref, wh_ref, bi_ref, wo_ref, bo_ref,
                     hid_ref, out_ref, h_carry):
    t = pl.program_id(0)

    # Initialize the carried hidden state on the first time block.
    @pl.when(t == 0)
    def _():
        h_carry[...] = h0_ref[...]

    bsz = h0_ref.shape[0]
    tb = x_ref.shape[0]

    # Hoisted out of the per-step loop (review): weight loads + bias broadcasts.
    wx = wx_ref[...]                                   # [n_x, 128]
    wh = wh_ref[...]                                   # [128, 128]
    wo = wo_ref[...]                                   # [128, 128]
    bi = jnp.broadcast_to(bi_ref[...], (bsz, LANE))    # [B, 128]
    bo = jnp.broadcast_to(bo_ref[...], (bsz, LANE))    # [B, 128] (-1e30 on pad lanes)

    def step(tt, h_prev):
        x_t = x_ref[tt]                                # [B, n_x] raw data slab
        # Split "concat" matmul: identical to cat(x, h) @ W_i2h.T  (disjoint K ranges).
        pre = (jnp.dot(h_prev, wh, preferred_element_type=jnp.float32)
               + jnp.dot(x_t, wx, preferred_element_type=jnp.float32)
               + bi)
        hidden = jnp.tanh(pre)                         # [B, 128]; padded lanes stay 0
        hid_ref[tt] = hidden

        logits = jnp.dot(hidden, wo, preferred_element_type=jnp.float32) + bo
        m = jnp.max(logits, axis=-1, keepdims=True)
        e = jnp.exp(logits - m)                        # padded lanes underflow to 0
        denom = jnp.sum(e, axis=-1, keepdims=True)
        out_ref[tt] = e * pl.reciprocal(denom)         # exact reciprocal (EUP slot)
        return hidden

    # Short fixed trip count -> fully unroll for LLO scheduler visibility.
    h_final = jax.lax.fori_loop(0, tb, step, h_carry[...], unroll=True)
    h_carry[...] = h_final


def prepare_params(w_i2h, b_i2h, w_h2o, b_h2o):
    """Hoisted, once-per-parameter-set packing into lane-padded, pre-transposed form.

    w_i2h: [n_a, n_x + n_a] (torch layout), b_i2h: [n_a]
    w_h2o: [n_y, n_a],                      b_h2o: [n_y]
    """
    n_a = w_i2h.shape[0]
    n_x = w_i2h.shape[1] - n_a
    n_y = w_h2o.shape[0]

    # Split i2h weight: Wx acts on the raw data, Wh on the (lane-padded) hidden.
    wx = jnp.zeros((n_x, LANE), jnp.float32).at[:, :n_a].set(jnp.transpose(w_i2h[:, :n_x]))
    wh = jnp.zeros((LANE, LANE), jnp.float32).at[:n_a, :n_a].set(jnp.transpose(w_i2h[:, n_x:]))
    bi = jnp.zeros((1, LANE), jnp.float32).at[0, :n_a].set(b_i2h)

    wo = jnp.zeros((LANE, LANE), jnp.float32).at[:n_a, :n_y].set(jnp.transpose(w_h2o))
    # -1e30 in padded logit lanes masks them out of the softmax.
    bo = jnp.full((1, LANE), -1e30, jnp.float32).at[0, :n_y].set(b_h2o)
    return (wx, wh, bi, wo, bo, n_x, n_a, n_y)


def rnn_sequence(data_seq, h0, params, time_block=32):
    """Run the RNN over a whole sequence inside ONE pallas_call.

    data_seq: [T, B, n_x], h0: [B, n_a]
    returns (hidden_seq [T, B, n_a], output_seq [T, B, n_y])
    """
    wx, wh, bi, wo, bo, n_x, n_a, n_y = params
    T, B, _ = data_seq.shape

    tb = min(time_block, T)            # TB timesteps per grid iteration
    nblk = pl.cdiv(T, tb)
    t_pad = nblk * tb

    x = data_seq.astype(jnp.float32)
    if t_pad != T:
        # Tiny tail pad (raw n_x width only) so every time block is full.
        x = jnp.concatenate([x, jnp.zeros((t_pad - T, B, n_x), jnp.float32)], axis=0)

    # Hidden carried in a 128-lane layout; padded lanes are exactly 0.
    h0p = jnp.zeros((B, LANE), jnp.float32).at[:, :n_a].set(h0)

    hid_seq, out_seq = pl.pallas_call(
        rnn_block_kernel,
        out_shape=(
            jax.ShapeDtypeStruct((t_pad, B, LANE), jnp.float32),
            jax.ShapeDtypeStruct((t_pad, B, LANE), jnp.float32),
        ),
        grid_spec=pltpu.PrefetchScalarGridSpec(
            num_scalar_prefetch=0,
            grid=(nblk,),
            in_specs=[
                pl.BlockSpec((tb, B, n_x), lambda t: (t, 0, 0)),    # TB-step data slab
                pl.BlockSpec((B, LANE), lambda t: (0, 0)),          # h0 (resident)
                pl.BlockSpec((n_x, LANE), lambda t: (0, 0)),        # Wx (resident)
                pl.BlockSpec((LANE, LANE), lambda t: (0, 0)),       # Wh (resident)
                pl.BlockSpec((1, LANE), lambda t: (0, 0)),          # i2h bias
                pl.BlockSpec((LANE, LANE), lambda t: (0, 0)),       # h2o W (resident)
                pl.BlockSpec((1, LANE), lambda t: (0, 0)),          # h2o bias + mask
            ],
            out_specs=(
                pl.BlockSpec((tb, B, LANE), lambda t: (t, 0, 0)),
                pl.BlockSpec((tb, B, LANE), lambda t: (t, 0, 0)),
            ),
            scratch_shapes=[pltpu.VMEM((B, LANE), jnp.float32)],    # carried hidden
        ),
        compiler_params=pltpu.CompilerParams(
            dimension_semantics=("arbitrary",)),       # time axis carries state
    )(x, h0p, wx, wh, bi, wo, bo)

    return hid_seq[:T, :, :n_a], out_seq[:T, :, :n_y]


def rnn_step(data, last_hidden, params):
    """Module forward (single step): data [B, n_x], last_hidden [B, n_a]."""
    hid_seq, out_seq = rnn_sequence(data[None], last_hidden, params)
    return hid_seq[0], out_seq[0]


if __name__ == "__main__":
    key = jax.random.PRNGKey(0)
    k1, k2, k3, k4, k5 = jax.random.split(key, 5)

    B = 2
    # Deterministic "init_weights"-style parameters (normal weights, zero biases).
    w_i2h = 0.01 * jax.random.normal(k1, (HIDDEN_SIZE, DATA_SIZE + HIDDEN_SIZE), jnp.float32)
    b_i2h = jnp.zeros((HIDDEN_SIZE,), jnp.float32)
    w_h2o = 0.01 * jax.random.normal(k2, (OUTPUT_SIZE, HIDDEN_SIZE), jnp.float32)
    b_h2o = jnp.zeros((OUTPUT_SIZE,), jnp.float32)

    params = prepare_params(w_i2h, b_i2h, w_h2o, b_h2o)  # hoisted, once per param set

    # --- single-step check (exactly the torch forward) ---
    data = jax.random.normal(k3, (B, DATA_SIZE), jnp.float32)
    last_hidden = jax.random.normal(k4, (B, HIDDEN_SIZE), jnp.float32)

    hidden, output = rnn_step(data, last_hidden, params)
    jax.block_until_ready((hidden, output))

    cat = jnp.concatenate([data, last_hidden], axis=1)
    hidden_ref = jnp.tanh(cat @ w_i2h.T + b_i2h)
    output_ref = jax.nn.softmax(hidden_ref @ w_h2o.T + b_h2o, axis=1)
    assert hidden.shape == (B, HIDDEN_SIZE) and output.shape == (B, OUTPUT_SIZE)
    assert jnp.allclose(hidden, hidden_ref, atol=1e-5), "hidden mismatch"
    assert jnp.allclose(output, output_ref, atol=1e-5), "output mismatch"

    # --- sequence check: recurrence + time blocking run entirely inside one kernel ---
    T = 8
    data_seq = jax.random.normal(k5, (T, B, DATA_SIZE), jnp.float32)
    h0 = jnp.zeros((B, HIDDEN_SIZE), jnp.float32)
    hid_seq, out_seq = rnn_sequence(data_seq, h0, params)
    jax.block_until_ready((hid_seq, out_seq))

    def step(h, x_t):
        c = jnp.concatenate([x_t, h], axis=1)
        h2 = jnp.tanh(c @ w_i2h.T + b_i2h)
        o = jax.nn.softmax(h2 @ w_h2o.T + b_h2o, axis=1)
        return h2, (h2, o)

    _, (hid_ref_seq, out_ref_seq) = jax.lax.scan(step, h0, data_seq)
    assert jnp.allclose(hid_seq, hid_ref_seq, atol=1e-4), "seq hidden mismatch"
    assert jnp.allclose(out_seq, out_ref_seq, atol=1e-4), "seq output mismatch"

    print("KERNEL_OK")
</pallas_src>

<mosaic_0001>
module attributes {stable_mosaic.version = 11 : i64} {
  func.func @rnn_block_kernel(%arg0: i32, %arg1: memref<1x2x27xf32, #tpu.memory_space<vmem>>, %arg2: memref<2x128xf32, #tpu.memory_space<vmem>>, %arg3: memref<27x128xf32, #tpu.memory_space<vmem>>, %arg4: memref<128x128xf32, #tpu.memory_space<vmem>>, %arg5: memref<1x128xf32, #tpu.memory_space<vmem>>, %arg6: memref<128x128xf32, #tpu.memory_space<vmem>>, %arg7: memref<1x128xf32, #tpu.memory_space<vmem>>, %arg8: memref<1x2x128xf32, #tpu.memory_space<vmem>>, %arg9: memref<1x2x128xf32, #tpu.memory_space<vmem>>, %arg10: memref<2x128xf32, #tpu.memory_space<vmem>>) attributes {dimension_semantics = [#tpu.dimension_semantics<arbitrary>], iteration_bounds = array<i64: 1>, scalar_prefetch = 0 : i64, scratch_operands = 1 : i64, tpu.core_type = #tpu.core_type<tc>, window_params = [{transform_indices = @transform_0, window_bounds = array<i64: 1, 2, 27>}, {pipeline_mode = #tpu.pipeline_mode<synchronous>, transform_indices = @transform_1, window_bounds = array<i64: 2, 128>}, {pipeline_mode = #tpu.pipeline_mode<synchronous>, transform_indices = @transform_2, window_bounds = array<i64: 27, 128>}, {pipeline_mode = #tpu.pipeline_mode<synchronous>, transform_indices = @transform_3, window_bounds = array<i64: 128, 128>}, {pipeline_mode = #tpu.pipeline_mode<synchronous>, transform_indices = @transform_4, window_bounds = array<i64: 1, 128>}, {pipeline_mode = #tpu.pipeline_mode<synchronous>, transform_indices = @transform_5, window_bounds = array<i64: 128, 128>}, {pipeline_mode = #tpu.pipeline_mode<synchronous>, transform_indices = @transform_6, window_bounds = array<i64: 1, 128>}, {transform_indices = @transform_7, window_bounds = array<i64: 1, 2, 128>}, {transform_indices = @transform_8, window_bounds = array<i64: 1, 2, 128>}]} {
    %c0_i32 = arith.constant 0 : i32
    %0 = arith.cmpi eq, %arg0, %c0_i32 : i32
    %1 = arith.extui %0 : i1 to i32
    %c0_i32_0 = arith.constant 0 : i32
    %2 = arith.cmpi ne, %1, %c0_i32_0 : i32
    scf.if %2 {
      %c0_25 = arith.constant 0 : index
      %c0_26 = arith.constant 0 : index
      %42 = vector.load %arg2[%c0_25, %c0_26] : memref<2x128xf32, #tpu.memory_space<vmem>>, vector<2x128xf32>
      %c0_27 = arith.constant 0 : index
      %c0_28 = arith.constant 0 : index
      %43 = vector.load %arg10[%c0_27, %c0_28] : memref<2x128xf32, #tpu.memory_space<vmem>>, vector<2x128xf32>
      tpu.vector_store %arg10[%c0_27, %c0_28], %42 {strides = array<i32>} : memref<2x128xf32, #tpu.memory_space<vmem>>, vector<2x128xf32>,
    } else {
    }
    %c0 = arith.constant 0 : index
    %c0_1 = arith.constant 0 : index
    %3 = vector.load %arg3[%c0, %c0_1] : memref<27x128xf32, #tpu.memory_space<vmem>>, vector<27x128xf32>
    %c0_2 = arith.constant 0 : index
    %c0_3 = arith.constant 0 : index
    %4 = vector.load %arg4[%c0_2, %c0_3] : memref<128x128xf32, #tpu.memory_space<vmem>>, vector<128x128xf32>
    %c0_4 = arith.constant 0 : index
    %c0_5 = arith.constant 0 : index
    %5 = vector.load %arg6[%c0_4, %c0_5] : memref<128x128xf32, #tpu.memory_space<vmem>>, vector<128x128xf32>
    %c0_6 = arith.constant 0 : index
    %c0_7 = arith.constant 0 : index
    %6 = vector.load %arg5[%c0_6, %c0_7] : memref<1x128xf32, #tpu.memory_space<vmem>>, vector<1x128xf32>
    %7 = vector.shape_cast %6 : vector<1x128xf32> to vector<1x128xf32>
    %8 = vector.broadcast %7 : vector<1x128xf32> to vector<2x128xf32>
    %c0_8 = arith.constant 0 : index
    %c0_9 = arith.constant 0 : index
    %9 = vector.load %arg7[%c0_8, %c0_9] : memref<1x128xf32, #tpu.memory_space<vmem>>, vector<1x128xf32>
    %10 = vector.shape_cast %9 : vector<1x128xf32> to vector<1x128xf32>
    %11 = vector.broadcast %10 : vector<1x128xf32> to vector<2x128xf32>
    %c0_10 = arith.constant 0 : index
    %c0_11 = arith.constant 0 : index
    %12 = vector.load %arg10[%c0_10, %c0_11] : memref<2x128xf32, #tpu.memory_space<vmem>>, vector<2x128xf32>
    %c0_i32_12 = arith.constant 0 : i32
    %13 = arith.index_cast %c0_i32_12 : i32 to index
    %c0_13 = arith.constant 0 : index
    %c0_14 = arith.constant 0 : index
    %14 = vector.load %arg1[%13, %c0_13, %c0_14] : memref<1x2x27xf32, #tpu.memory_space<vmem>>, vector<1x2x27xf32>
    %15 = vector.shape_cast %14 : vector<1x2x27xf32> to vector<2x27xf32>
    %cst = arith.constant dense<0.000000e+00> : vector<2x128xf32>
    %16 = tpu.matmul %12, %4, %cst {dimension_numbers = #tpu.dot_dimension_numbers<[1], [0], [0], [1], [0, 0, 1, 1], [], []>} : vector<2x128xf32>, vector<128x128xf32>, vector<2x128xf32> -> vector<2x128xf32>
    %cst_15 = arith.constant dense<0.000000e+00> : vector<2x128xf32>
    %17 = tpu.matmul %15, %3, %cst_15 {dimension_numbers = #tpu.dot_dimension_numbers<[1], [0], [0], [1], [0, 0, 1, 1], [], []>} : vector<2x27xf32>, vector<27x128xf32>, vector<2x128xf32> -> vector<2x128xf32>
    %18 = arith.addf %16, %17 : vector<2x128xf32>
    %19 = arith.addf %18, %8 : vector<2x128xf32>
    %20 = math.tanh %19 : vector<2x128xf32>
    %21 = arith.index_cast %c0_i32_12 : i32 to index
    %c0_16 = arith.constant 0 : index
    %c0_17 = arith.constant 0 : index
    %22 = vector.load %arg8[%21, %c0_16, %c0_17] : memref<1x2x128xf32, #tpu.memory_space<vmem>>, vector<1x2x128xf32>
    %23 = vector.shape_cast %22 : vector<1x2x128xf32> to vector<2x128xf32>
    %24 = vector.shape_cast %20 : vector<2x128xf32> to vector<1x2x128xf32>
    tpu.vector_store %arg8[%21, %c0_16, %c0_17], %24 {strides = array<i32>} : memref<1x2x128xf32, #tpu.memory_space<vmem>>, vector<1x2x128xf32>,
    %cst_18 = arith.constant dense<0.000000e+00> : vector<2x128xf32>
    %25 = tpu.matmul %20, %5, %cst_18 {dimension_numbers = #tpu.dot_dimension_numbers<[1], [0], [0], [1], [0, 0, 1, 1], [], []>} : vector<2x128xf32>, vector<128x128xf32>, vector<2x128xf32> -> vector<2x128xf32>
    %26 = arith.addf %25, %11 : vector<2x128xf32>
    %cst_19 = arith.constant dense<0xFF800000> : vector<2xf32>
    %27 = vector.multi_reduction <maximumf>, %26, %cst_19 [1] : vector<2x128xf32> to vector<2xf32>
    %28 = vector.shape_cast %27 : vector<2xf32> to vector<2x1xf32>
    %29 = vector.broadcast %28 : vector<2x1xf32> to vector<2x128xf32>
    %30 = arith.subf %26, %29 : vector<2x128xf32>
    %31 = math.exp %30 : vector<2x128xf32>
    %cst_20 = arith.constant dense<0.000000e+00> : vector<2xf32>
    %32 = vector.multi_reduction <add>, %31, %cst_20 [1] : vector<2x128xf32> to vector<2xf32>
    %33 = vector.shape_cast %32 : vector<2xf32> to vector<2x1xf32>
    %34 = tpu.reciprocal %33 : vector<2x1xf32> -> vector<2x1xf32>
    %35 = vector.broadcast %34 : vector<2x1xf32> to vector<2x128xf32>
    %36 = arith.mulf %31, %35 : vector<2x128xf32>
    %37 = arith.index_cast %c0_i32_12 : i32 to index
    %c0_21 = arith.constant 0 : index
    %c0_22 = arith.constant 0 : index
    %38 = vector.load %arg9[%37, %c0_21, %c0_22] : memref<1x2x128xf32, #tpu.memory_space<vmem>>, vector<1x2x128xf32>
    %39 = vector.shape_cast %38 : vector<1x2x128xf32> to vector<2x128xf32>
    %40 = vector.shape_cast %36 : vector<2x128xf32> to vector<1x2x128xf32>
    tpu.vector_store %arg9[%37, %c0_21, %c0_22], %40 {strides = array<i32>} : memref<1x2x128xf32, #tpu.memory_space<vmem>>, vector<1x2x128xf32>,
    %c1_i32 = arith.constant 1 : i32
    %c0_23 = arith.constant 0 : index
    %c0_24 = arith.constant 0 : index
    %41 = vector.load %arg10[%c0_23, %c0_24] : memref<2x128xf32, #tpu.memory_space<vmem>>, vector<2x128xf32>
    tpu.vector_store %arg10[%c0_23, %c0_24], %20 {strides = array<i32>} : memref<2x128xf32, #tpu.memory_space<vmem>>, vector<2x128xf32>,
    return
  }
  func.func @transform_0(%arg0: i32) -> (i32, i32, i32) {
    %c0_i32 = arith.constant 0 : i32
    %c0_i32_0 = arith.constant 0 : i32
    %c0_i32_1 = arith.constant 0 : i32
    return %arg0, %c0_i32, %c0_i32_0 : i32, i32, i32
  }
  func.func @transform_1(%arg0: i32) -> (i32, i32) {
    %c0_i32 = arith.constant 0 : i32
    %c0_i32_0 = arith.constant 0 : i32
    %c0_i32_1 = arith.constant 0 : i32
    return %c0_i32, %c0_i32_0 : i32, i32
  }
  func.func @transform_2(%arg0: i32) -> (i32, i32) {
    %c0_i32 = arith.constant 0 : i32
    %c0_i32_0 = arith.constant 0 : i32
    %c0_i32_1 = arith.constant 0 : i32
    return %c0_i32, %c0_i32_0 : i32, i32
  }
  func.func @transform_3(%arg0: i32) -> (i32, i32) {
    %c0_i32 = arith.constant 0 : i32
    %c0_i32_0 = arith.constant 0 : i32
    %c0_i32_1 = arith.constant 0 : i32
    return %c0_i32, %c0_i32_0 : i32, i32
  }
  func.func @transform_4(%arg0: i32) -> (i32, i32) {
    %c0_i32 = arith.constant 0 : i32
    %c0_i32_0 = arith.constant 0 : i32
    %c0_i32_1 = arith.constant 0 : i32
    return %c0_i32, %c0_i32_0 : i32, i32
  }
  func.func @transform_5(%arg0: i32) -> (i32, i32) {
    %c0_i32 = arith.constant 0 : i32
    %c0_i32_0 = arith.constant 0 : i32
    %c0_i32_1 = arith.constant 0 : i32
    return %c0_i32, %c0_i32_0 : i32, i32
  }
  func.func @transform_6(%arg0: i32) -> (i32, i32) {
    %c0_i32 = arith.constant 0 : i32
    %c0_i32_0 = arith.constant 0 : i32
    %c0_i32_1 = arith.constant 0 : i32
    return %c0_i32, %c0_i32_0 : i32, i32
  }
  func.func @transform_7(%arg0: i32) -> (i32, i32, i32) {
    %c0_i32 = arith.constant 0 : i32
    %c0_i32_0 = arith.constant 0 : i32
    %c0_i32_1 = arith.constant 0 : i32
    return %arg0, %c0_i32, %c0_i32_0 : i32, i32, i32
  }
  func.func @transform_8(%arg0: i32) -> (i32, i32, i32) {
    %c0_i32 = arith.constant 0 : i32
    %c0_i32_0 = arith.constant 0 : i32
    %c0_i32_1 = arith.constant 0 : i32
    return %arg0, %c0_i32, %c0_i32_0 : i32, i32, i32
  }
}

</mosaic_0001>

<bundles_post_ra>
// kernel: tpu_custom_call.1
= control target key start
LH: loop header
LB: loop body
LE: loop exit
PB: predicated region body
PF: predicated region fallthrough
CT: control target
= control target key end

     0   :  { %14 = vsyncpa [#allocation4], 0  ;;  %s567_s0 = inlined_call_operand.hbm [shape: f32[1,2,27], index: 0, kind: input, shape index: {}]   ;;  %s568_s1 = inlined_call_operand.hbm [shape: f32[2,128], index: 1, kind: input, shape index: {}]   ;;  %s569_s2 = inlined_call_operand.hbm [shape: f32[27,128], index: 2, kind: input, shape index: {}]   ;;  %s570_s3 = inlined_call_operand.hbm [shape: f32[128,128], index: 3, kind: input, shape index: {}]   ;;  %s571_s4 = inlined_call_operand.vmem [shape: f32[1,128], index: 4, kind: input, shape index: {}]   ;;  %s572_s5 = inlined_call_operand.hbm [shape: f32[128,128], index: 5, kind: input, shape index: {}]   ;;  %s573_s6 = inlined_call_operand.vmem [shape: f32[1,128], index: 6, kind: input, shape index: {}]   ;;  %s574_s7 = inlined_call_operand.hbm [shape: f32[1,2,128], index: 7, kind: output, shape index: {0}]   ;;  %s575_s8 = inlined_call_operand.hbm [shape: f32[1,2,128], index: 8, kind: output, shape index: {1}]  }
   0x1   :  { %15 = vsyncpa [#allocation7], 0 }
   0x2   :  { %16 = vsyncpa [#allocation10], 0 }
   0x3   :  { %17 = vsyncpa [#allocation5], 0  ;;  %s35_s29 = sshll.u32 %s568_s1, 4  ;;  %s36_s29 = int_to_ptr.hbm [resolvable:$true] %s35_s29 }
   0x4   :  { %18 = vsyncpa [#allocation14], 0  ;;  %s486_s30 = smov [#allocation6]   ;;  %s58_s12 = sshll.u32 %s570_s3, 4  ;;  %s59_s12 = int_to_ptr.hbm [resolvable:$true] %s58_s12 }
   0x5   :  { %s37_s9 = sshll.u32 %s486_s30, 4  ;;  %s487_s13 = smov [#allocation9]   ;;  %s38_s9 = int_to_ptr.vmem [resolvable:$true] %s37_s9 }
   0x6   :  { %40 = dma.hbm_to_vmem [thread:$0]  %s36_s29, 32, %s38_s9, [#allocation7]  }
   0x7   :  { %s60_s14 = sshll.u32 %s487_s13, 4  ;;  %s24_s17 = sshll.u32 %s567_s0, 4  ;;  %s61_s14 = int_to_ptr.vmem [resolvable:$true] %s60_s14  ;;  %s25_s17 = int_to_ptr.hbm [resolvable:$true] %s24_s17 }
   0x8   :  { %s488_s1 = smov 128   ;;  %s489_s18 = smov 8  }
   0x9   :  { %66 = dma.hbm_to_vmem [thread:$0]  %s59_s12, 2048, %s61_s14, [#allocation10], %s488_s1, %s488_s1, %s489_s18  }
   0xa   :  { %s45_s21 = sshll.u32 %s569_s2, 4  ;;  %s490_s22 = smov [#allocation3]   ;;  %s46_s21 = int_to_ptr.hbm [resolvable:$true] %s45_s21 }
   0xb   :  { %s26_s23 = sshll.u32 %s490_s22, 4  ;;  %s491_s3 = smov [#allocation8]   ;;  %s27_s23 = int_to_ptr.vmem [resolvable:$true] %s26_s23 }
   0xc   :  { %29 = dma.hbm_to_vmem [thread:$0]  %s25_s17, 32, %s27_s23, [#allocation4]  }
   0xd   :  { %s47_s24 = sshll.u32 %s491_s3, 4  ;;  %s73_s0 = sshll.u32 %s572_s5, 4  ;;  %s48_s24 = int_to_ptr.vmem [resolvable:$true] %s47_s24  ;;  %s74_s0 = int_to_ptr.hbm [resolvable:$true] %s73_s0 }
   0xe   :  { %53 = dma.hbm_to_vmem [thread:$0]  %s46_s21, 512, %s48_s24, [#allocation7], %s488_s1, %s488_s1, %s489_s18  }
   0xf   :  { %s492_s27 = smov [#allocation11]  }
  0x10   :  { %s75_s28 = sshll.u32 %s492_s27, 4  ;;  %s76_s28 = int_to_ptr.vmem [resolvable:$true] %s75_s28 }
  0x11   :  { %81 = dma.hbm_to_vmem [thread:$0]  %s74_s0, 2048, %s76_s28, [#allocation10], %s488_s1, %s488_s1, %s489_s18  }
  0x12   :  { %476 = dma.done.wait [#allocation4], 32  }
  0x13   :  { %477 = vsyncadd [#allocation4], 4294967264 }
  0x14   :  { %478 = dma.done.wait [#allocation7], 544  }
  0x15   :  { %479 = vsyncadd [#allocation7], 4294966752 }
  0x16   :  { %480 = dma.done.wait [#allocation10], 4096  }
  0x17   :  { %481 = vsyncadd [#allocation10], 4294963200  ;;  %v129_v0 = vld [vmem:[#allocation9 + $0x78] sm:$0xff]  ;;  %v128_v1 = vld [vmem:[#allocation9 + $0x70] sm:$0xff]  ;;  %vm160_vm0 = vcmask 1042432   ;;  %vm156_vm1 = vcmask 220160  }
  0x18   :  { %184 = vmatpush.msra.mxu1 %v129_v0  ;;  %v127_v2 = vld [vmem:[#allocation9 + $0x68] sm:$0xff]  ;;  %v126_v3 = vld [vmem:[#allocation9 + $0x60] sm:$0xff]  ;;  %v113_v4 = vld [vmem:[#allocation8 + $0x18] sm:$0x7]  ;;  %vm227_vm2 = vcmask 1041408   ;;  %s261_s10 = sshll.u32 %s574_s7, 4  ;;  %s262_s10 = int_to_ptr.hbm [resolvable:$true] %s261_s10 }
  0x19   :  { %v112_v5 = vld [vmem:[#allocation8 + $0x10] sm:$0xff]  ;;  %289 = vmatpush.msk.msra.mxu0 %vm160_vm0, %v113_v4  ;;  %v125_v6 = vld [vmem:[#allocation9 + $0x58] sm:$0xff]  ;;  %v111_v7 = vld [vmem:[#allocation8 + $0x8] sm:$0xff]  ;;  %s493_s11 = smov [#allocation12]   ;;  %s272_s15 = sshll.u32 %s575_s8, 4  ;;  %s273_s15 = int_to_ptr.hbm [resolvable:$true] %s272_s15 }
  0x1a   :  { %185 = vmatpush.msra.mxu1 %v128_v1  ;;  %v108_v8 = vld [vmem:[#allocation6] sm:$0x3]  ;;  %v144_v10 = vld [vmem:[#allocation11 + $0x70] sm:$0xff]  ;;  %v110_v12 = vld [vmem:[#allocation8] sm:$0xff]  ;;  %s259_s12 = sshll.u32 %s493_s11, 4  ;;  %s260_s12 = int_to_ptr.vmem [resolvable:$true] %s259_s12 }
  0x1b   :  { %177 = vmatpush.msra.mxu0 %v112_v5  ;;  %v145_v9 = vld [vmem:[#allocation11 + $0x78] sm:$0xff]  ;;  %v124_v11 = vld [vmem:[#allocation9 + $0x50] sm:$0xff]  ;;  %109 = vst [vmem:[#allocation2] sm:$0x3] %v108_v8  ;;  %v143_v14 = vld [vmem:[#allocation11 + $0x68] sm:$0xff] }
  0x1c   :  { %186 = vmatpush.msra.mxu1 %v127_v2  ;;  %207 = vmatpush.msra.mxu2 %v145_v9  ;;  %v155_v13 = vld [vmem:[#allocation3] sm:$0x3]  ;;  %v123_v15 = vld [vmem:[#allocation9 + $0x48] sm:$0xff]  ;;  %v142_v16 = vld [vmem:[#allocation11 + $0x60] sm:$0xff] }
  0x1d   :  { %178 = vmatpush.msra.mxu0 %v111_v7  ;;  %v122_v17 = vld [vmem:[#allocation9 + $0x40] sm:$0xff]  ;;  %v141_v18 = vld [vmem:[#allocation11 + $0x58] sm:$0xff]  ;;  %v140_v20 = vld [vmem:[#allocation11 + $0x50] sm:$0xff] }
  0x1e   :  { %187 = vmatpush.msra.mxu1 %v126_v3  ;;  %208 = vmatpush.msra.mxu2 %v144_v10  ;;  %v121_v19 = vld [vmem:[#allocation9 + $0x38] sm:$0xff]  ;;  %v120_v21 = vld [vmem:[#allocation9 + $0x30] sm:$0xff]  ;;  %v139_v22 = vld [vmem:[#allocation11 + $0x48] sm:$0xff] }
  0x1f   :  { %179 = vmatpush.msra.mxu0 %v110_v12  ;;  %v119_v23 = vld [vmem:[#allocation9 + $0x28] sm:$0xff]  ;;  %v138_v24 = vld [vmem:[#allocation11 + $0x40] sm:$0xff]  ;;  %v137_v26 = vld [vmem:[#allocation11 + $0x38] sm:$0xff] }
  0x20   :  { %188 = vmatpush.msra.mxu1 %v125_v6  ;;  %290 = vmatmul.msk.f32.vlgmr.msra.gmra.mxu0 %vm156_vm1, %v155_v13  ;;  %v118_v25 = vld [vmem:[#allocation9 + $0x20] sm:$0xff]  ;;  %v117_v27 = vld [vmem:[#allocation9 + $0x18] sm:$0xff]  ;;  %v136_v28 = vld [vmem:[#allocation11 + $0x30] sm:$0xff] }
  0x21   :  { %209 = vmatpush.msra.mxu2 %v143_v14  ;;  %v116_v29 = vld [vmem:[#allocation9 + $0x10] sm:$0xff]  ;;  %v115_v30 = vld [vmem:[#allocation9 + $0x8] sm:$0xff]  ;;  %v114_v31 = vld [vmem:[#allocation9] sm:$0xff] }
  0x22   :  { %189 = vmatpush.msra.mxu1 %v124_v11  ;;  %v154_v32 = vld [vmem:[#allocation2] sm:$0x3]  ;;  %v135_v33 = vld [vmem:[#allocation11 + $0x28] sm:$0xff]  ;;  %v134_v34 = vld [vmem:[#allocation11 + $0x20] sm:$0xff] }
  0x23   :  { %210 = vmatpush.msra.mxu2 %v142_v16  ;;  %v133_v35 = vld [vmem:[#allocation11 + $0x18] sm:$0xff]  ;;  %v132_v36 = vld [vmem:[#allocation11 + $0x10] sm:$0xff]  ;;  %v131_v37 = vld [vmem:[#allocation11 + $0x8] sm:$0xff] }
  0x24   :  { %190 = vmatpush.msra.mxu1 %v123_v15  ;;  %v130_v38 = vld [vmem:[#allocation11] sm:$0xff]  ;;  %v300_v40 = vld [vmem:[%s571_s4] ss:$0 sm:$0xff] }
  0x25   :  { %211 = vmatpush.msra.mxu2 %v141_v18  ;;  %v301_v45 = vld [vmem:[%s573_s6] ss:$0 sm:$0xff]  ;;  %s494_s6 = smov [#allocation13]  }
  0x26   :  { %191 = vmatpush.msra.mxu1 %v122_v17  ;;  %s270_s7 = sshll.u32 %s494_s6, 4  ;;  %s271_s7 = int_to_ptr.vmem [resolvable:$true] %s270_s7 }
  0x27   :  { %212 = vmatpush.msra.mxu2 %v140_v20 }
  0x28   :  { %192 = vmatpush.msra.mxu1 %v121_v19 }
  0x29   :  { %213 = vmatpush.msra.mxu2 %v139_v22 }
  0x2a   :  { %193 = vmatpush.msra.mxu1 %v120_v21 }
  0x2b   :  { %214 = vmatpush.msra.mxu2 %v138_v24 }
  0x2c   :  { %194 = vmatpush.msra.mxu1 %v119_v23 }
  0x2d   :  { %215 = vmatpush.msra.mxu2 %v137_v26 }
  0x2e   :  { %195 = vmatpush.msra.mxu1 %v118_v25 }
  0x2f   :  { %216 = vmatpush.msra.mxu2 %v136_v28 }
  0x30   :  { %196 = vmatpush.msra.mxu1 %v117_v27 }
  0x31   :  { %217 = vmatpush.msra.mxu2 %v135_v33 }
  0x32   :  { %197 = vmatpush.msra.mxu1 %v116_v29 }
  0x33   :  { %218 = vmatpush.msra.mxu2 %v134_v34 }
  0x34   :  { %198 = vmatpush.msra.mxu1 %v115_v30 }
  0x35   :  { %219 = vmatpush.msra.mxu2 %v133_v35 }
  0x36   :  { %199 = vmatpush.msra.mxu1 %v114_v31 }
  0x37   :  { %200 = vmatmul.f32.vlgmr.msra.gmra.mxu1 %v154_v32  ;;  %220 = vmatpush.msra.mxu2 %v132_v36 }
  0x39   :  { %221 = vmatpush.msra.mxu2 %v131_v37 }
  0x3b   :  { %222 = vmatpush.msra.mxu2 %v130_v38 }
  0x9d   :  { %v181_v39 = vpop.f32.mrf.mxu0 }
  0xb4   :  { %v201_v41 = vpop.f32.mrf.mxu1 }
  0xb5   :  { %v202_v42 = vadd.f32 %v201_v41, %v181_v39 }
  0xb7   :  { %v204_v43 = vadd.f32 %v300_v40, %v202_v42 }
  0xb9   :  { %302 = vtanh.f32 %v204_v43 }
  0xbf   :  { %v303_v44 = vpop.eup %302 }
  0xc0   :  { %253 = vst [vmem:[#allocation2] sm:$0x3] %v303_v44  ;;  %223 = vmatmul.f32.vlgmr.msra.gmra.mxu2 %v303_v44 }
  0xc1   :  { %206 = vst [vmem:[#allocation12] sm:$0x3] %v303_v44 }
  0xc2   :  { %264 = dma.vmem_to_hbm [thread:$0]  %s260_s12, 32, %s262_s10, [#allocation5]  }
 0x143   :  { %v224_v46 = vpop.f32.mrf.mxu2 }
 0x144   :  { %v225_v47 = vadd.f32 %v301_v45, %v224_v46 }
 0x146   :  { %v228_v48 = vsel %vm227_vm2, %v225_v47, -inf }
 0x147   :  { %229 = vmax.xlane.f32.xlu0 %v228_v48 }
 0x1ba   :  { %v230_v49 = vpop.xlane.xlu0 %229 }
 0x1bb   :  { %v231_v50 = vsub.f32 %v225_v47, %v230_v49 }
 0x1bd   :  { %v232_v51 = vmul.f32 1.442695, %v231_v50 }
 0x1bf   :  { %304 = vpow2.f32 %v232_v51 }
 0x1c5   :  { %v305_v52 = vpop.eup %304 }
 0x1c6   :  { %v234_v53 = vsel %vm227_vm2, %v305_v52, 0.0 }
 0x1c7   :  { %235 = vadd.xlane.f32.xlu0 %v234_v53 }
 0x23a   :  { %v236_v54 = vpop.xlane.xlu0 %235 }
 0x23b   :  { %306 = vrcp.f32 %v236_v54  ;;  %v248_v58 = vand.u32 2147483648, %v236_v54  ;;  %v246_v60 = vand.u32 2147483647, %v236_v54  ;;  %vm242_vm4 = vweird.f32 %v236_v54 }
 0x23d   :  { %v249_v62 = vor.u32 1.1754944e-38, %v248_v58  ;;  %vm247_vm6 = vcmp.eq.f32.partialorder %v246_v60, 8.507059e+37 }
 0x241   :  { %v307_v55 = vpop.eup %306 }
 0x242   :  { %v238_v56 = vmul.f32 %v307_v55, %v236_v54  ;;  %vm243_vm3 = vweird.f32 %v307_v55 }
 0x243   :  { %vm244_vm5 = vmor %vm242_vm4, %vm243_vm3 }
 0x244   :  { %v239_v57 = vsub.f32 1.0, %v238_v56 }
 0x246   :  { %v240_v59 = vmul.f32 %v307_v55, %v239_v57 }
 0x248   :  { %v241_v61 = vadd.f32 %v307_v55, %v240_v59 }
 0x24a   :  { %v245_v63 = vsel %vm244_vm5, %v307_v55, %v241_v61 }
 0x24b   :  { %v250_v0 = vsel %vm247_vm6, %v249_v62, %v245_v63 }
 0x24c   :  { %v251_v1 = vmul.f32 %v305_v52, %v250_v0 }
 0x24e   :  { %252 = vst [vmem:[#allocation13] sm:$0x3] %v251_v1 }
 0x24f   :  { %275 = dma.vmem_to_hbm [thread:$0]  %s271_s7, 32, %s273_s15, [#allocation14]  }
 0x250   :  { %482 = dma.done.wait [#allocation5], 32  }
 0x251   :  { %483 = vsyncadd [#allocation5], 4294967264 }
 0x252   :  { %484 = dma.done.wait [#allocation14], 32  }
 0x253   :  { %485 = vsyncadd [#allocation14], 4294967264 }
 0x254   :  { %284 = vsyncpa [#allocation4], 1 }
 0x255   :  { %285 = vsyncpa [#allocation7], 1 }
 0x256   :  { %286 = vsyncpa [#allocation10], 1 }
 0x257   :  { %287 = vsyncpa [#allocation5], 1 }
 0x258   :  { %288 = vsyncpa [#allocation14], 1 }

</bundles_post_ra>
